<compile_context>
chip_gen: v6e
topology: v6e:2x2x1
jax: 0.10.0
libtpu: 0.0.40
codegen_flags: <defaults>
</compile_context>

<pallas_src>
import jax
import jax.numpy as jnp
from jax.experimental import pallas as pl
from jax.experimental.pallas import tpu as pltpu


def _lms_kernel(x_ref, w_ref, b_ref, o_ref):
    # x_ref: (tb, K)  batch on sublanes, features on lanes (natural layout)
    # w_ref: (1, K)   weight row, broadcast across sublanes
    # b_ref: (1,)     bias scalar in SMEM
    # o_ref: (tb, 1)  per-row result
    prod = x_ref[...] * w_ref[...]                          # VPU elementwise
    y = jnp.sum(prod, axis=1, keepdims=True)                # K-lane reduce
    o_ref[...] = y + b_ref[0]                               # scalar bias from SMEM


def lms_forward(x, weight, bias, *, block_b=8192):
    """Pallas forward of torch.nn.Linear(10, 1).

    x:      (B, 10) float32
    weight: (1, 10) float32   (out_features, in_features), PyTorch convention
    bias:   (1,)    float32
    returns (B, 1)  float32
    """
    B, K = x.shape
    O = weight.shape[0]

    b = bias.reshape(O)                       # (1,) scalar for SMEM
    w = weight.reshape(O, K)                  # (1, 10) row, used as-is (no transpose)

    # Tile the batch.  Keep >= 2 grid steps whenever possible so both v7x
    # TensorCores participate; keep tb a multiple of 8 (sublane) when tiling.
    block_b = max(8, (int(block_b) // 8) * 8)
    if B <= 8:
        tb = B                                              # single full-extent block
    elif B <= block_b:
        tb = min(block_b, ((B + 1) // 2 + 7) // 8 * 8)      # split in ~half
    else:
        tb = block_b
    grid_b = pl.cdiv(B, tb)                   # ragged last block handled by Pallas

    out = pl.pallas_call(
        _lms_kernel,
        out_shape=jax.ShapeDtypeStruct((B, O), jnp.float32),
        grid=(grid_b,),
        in_specs=[
            pl.BlockSpec((tb, K), lambda i: (i, 0)),              # x tile, double-buffered DMA
            pl.BlockSpec((O, K), lambda i: (0, 0)),               # weight row, resident
            pl.BlockSpec(memory_space=pltpu.MemorySpace.SMEM),    # bias scalar in SMEM
        ],
        out_specs=pl.BlockSpec((tb, O), lambda i: (i, 0)),
        compiler_params=pltpu.CompilerParams(
            dimension_semantics=("parallel",),     # v7x: 2 TCs split the batch grid
            vmem_limit_bytes=32 * 1024 * 1024,     # safe on v5e/v6e/v7x for tb=8192
        ),
    )(x, w, b)

    return out


if __name__ == "__main__":
    key = jax.random.PRNGKey(0)
    kx, kw, kb = jax.random.split(key, 3)

    B, IN, OUT = 1000, 10, 1          # B=1000 exercises >=2 grid steps + ragged last block
    x = jax.random.normal(kx, (B, IN), dtype=jnp.float32)

    # Deterministic parameter init (mimics nn.Linear's uniform(-1/sqrt(in), 1/sqrt(in)))
    bound = 1.0 / jnp.sqrt(jnp.float32(IN))
    weight = jax.random.uniform(kw, (OUT, IN), dtype=jnp.float32,
                                minval=-bound, maxval=bound)
    bias = jax.random.uniform(kb, (OUT,), dtype=jnp.float32,
                              minval=-bound, maxval=bound)

    out = lms_forward(x, weight, bias)
    jax.block_until_ready(out)

    # Sanity check against plain-JAX reference of nn.Linear semantics.
    ref = x @ weight.T + bias
    assert out.shape == (B, OUT)
    assert jnp.allclose(out, ref, atol=1e-5, rtol=1e-5)

    print("KERNEL_OK")
</pallas_src>

<mosaic_0001>
module attributes {stable_mosaic.version = 11 : i64} {
  func.func @_lms_kernel(%arg0: i32, %arg1: memref<504x10xf32, #tpu.memory_space<vmem>>, %arg2: memref<1x10xf32, #tpu.memory_space<vmem>>, %arg3: memref<1xf32, #tpu.memory_space<smem>>, %arg4: memref<504x1xf32, #tpu.memory_space<vmem>>) attributes {dimension_semantics = [#tpu.dimension_semantics<parallel>], iteration_bounds = array<i64: 2>, scalar_prefetch = 0 : i64, scratch_operands = 0 : i64, tpu.core_type = #tpu.core_type<tc>, window_params = [{transform_indices = @transform_0, window_bounds = array<i64: 504, 10>}, {pipeline_mode = #tpu.pipeline_mode<synchronous>, transform_indices = @transform_1, window_bounds = array<i64: 1, 10>}, {transform_indices = @transform_2, window_bounds = array<i64: 1>}, {transform_indices = @transform_3, window_bounds = array<i64: 504, 1>}]} {
    %c0 = arith.constant 0 : index
    %c0_0 = arith.constant 0 : index
    %0 = vector.load %arg1[%c0, %c0_0] : memref<504x10xf32, #tpu.memory_space<vmem>>, vector<504x10xf32>
    %c0_1 = arith.constant 0 : index
    %c0_2 = arith.constant 0 : index
    %1 = vector.load %arg2[%c0_1, %c0_2] : memref<1x10xf32, #tpu.memory_space<vmem>>, vector<1x10xf32>
    %2 = vector.broadcast %1 : vector<1x10xf32> to vector<504x10xf32>
    %3 = arith.mulf %0, %2 : vector<504x10xf32>
    %cst = arith.constant dense<0.000000e+00> : vector<504xf32>
    %4 = vector.multi_reduction <add>, %3, %cst [1] : vector<504x10xf32> to vector<504xf32>
    %5 = vector.shape_cast %4 : vector<504xf32> to vector<504x1xf32>
    %c0_3 = arith.constant 0 : index
    %6 = memref.load %arg3[%c0_3] : memref<1xf32, #tpu.memory_space<smem>>
    %7 = vector.broadcast %6 : f32 to vector<504x1xf32>
    %8 = arith.addf %5, %7 : vector<504x1xf32>
    %c0_4 = arith.constant 0 : index
    %c0_5 = arith.constant 0 : index
    %9 = vector.load %arg4[%c0_4, %c0_5] : memref<504x1xf32, #tpu.memory_space<vmem>>, vector<504x1xf32>
    tpu.vector_store %arg4[%c0_4, %c0_5], %8 {strides = array<i32>} : memref<504x1xf32, #tpu.memory_space<vmem>>, vector<504x1xf32>,
    return
  }
  func.func @transform_0(%arg0: i32) -> (i32, i32) {
    %c0_i32 = arith.constant 0 : i32
    %c0_i32_0 = arith.constant 0 : i32
    return %arg0, %c0_i32 : i32, i32
  }
  func.func @transform_1(%arg0: i32) -> (i32, i32) {
    %c0_i32 = arith.constant 0 : i32
    %c0_i32_0 = arith.constant 0 : i32
    %c0_i32_1 = arith.constant 0 : i32
    return %c0_i32, %c0_i32_0 : i32, i32
  }
  func.func @transform_2(%arg0: i32) -> i32 {
    %c0_i32 = arith.constant 0 : i32
    %c0_i32_0 = arith.constant 0 : i32
    return %c0_i32 : i32
  }
  func.func @transform_3(%arg0: i32) -> (i32, i32) {
    %c0_i32 = arith.constant 0 : i32
    %c0_i32_0 = arith.constant 0 : i32
    return %arg0, %c0_i32 : i32, i32
  }
}

</mosaic_0001>

<bundles_post_ra>
// kernel: tpu_custom_call.1
= control target key start
LH: loop header
LB: loop body
LE: loop exit
PB: predicated region body
PF: predicated region fallthrough
CT: control target
= control target key end

     0   :  { %s2072_s0 = inlined_call_operand.vmem [shape: f32[1000,10], index: 0, kind: input, shape index: {}]   ;;  %s2073_s1 = inlined_call_operand.vmem [shape: f32[1,10], index: 1, kind: input, shape index: {}]   ;;  %s2074_s2 = inlined_call_operand.<no memory space> [shape: f32[1], index: 2, kind: input, shape index: {}]   ;;  %s2075_s3 = inlined_call_operand.vmem [shape: f32[1000,1], index: 3, kind: output, shape index: {}]  }
   0x1   :  { %8 = sst [smem:[#allocation2]] %s2074_s2 }
   0x2   :  { %s1335_s14 = smov 0   ;;  %s1337_s15 = smov 0  }
   0x3   :  { %s1339_s16 = smov 0  }
   0x4 LB: > { %s1348_s2 = sadd.s32 4294967295, %s1278_s16   ;;  %s1350_s17 = sadd.s32 1, %s1278_s16   ;;  %s1278_s16 = sphi %s1339_s16, %s2084_s16   ;;  %s1274_s15 = sphi %s1337_s15, %s2083_s15   ;;  %s1270_s14 = sphi %s1335_s14, %s2082_s14  }
   0x5   : > { %s86_s18 = ssub.s32 %s1278_s16, %s1350_s17  ;;  %s89_s19 = sadd.s32 1, %s1274_s15 }
   0x6   : > { %p87_p0 = scmp.eq.s32.totalorder %s86_s18, 0  ;;  %p99_p1 = scmp.ne.s32.totalorder %s1274_s15, %s1270_s14 }
   0x7   : > { %p100_p2 = scmp.eq.s32.totalorder %s1348_s2, 1  ;;  %p1114_p3 = scmp.ge.s32.totalorder %s1278_s16, 1 }
   0x8   : > { %s1358_s20 = scalar_select %p87_p0, %s1274_s15, %s89_s19  }
   0x9   : > { %p1360_p4 = por %p100_p2, %p99_p1  ;;  %p147_p5 = scmp.lt.s32.totalorder %s1278_s16, 3 }
   0xb   : > { %p148_p6 = pnand %p1114_p3, %p147_p5 }
   0xc   : > { %s1365_s22 = smul.u32 (!%p148_p6), 63, %s1348_s2  ;;  %s516_s30 = sld [smem:[#allocation2]] (!%p148_p6) }
   0xd   : > { %151 = sbr.rel (%p148_p6) target bundleno = 369 (0x171), region = 32  ;;  %s171_s4 = sand.u32 (!%p148_p6), 1, %s1270_s14  }
   0xe   : > { %p179_p7 = scmp.lt.s32.totalorder (!%p148_p6), %s1365_s22, 124  ;;  %s1130_s5 = smul.u32 (!%p148_p6), 504, %s171_s4 }
  0x10   : > { %s1684_s6 = scalar_lea.vmem (!%p148_p6), [#allocation3], %s1130_s5  }
  0x12   : > { %s180_s23 = scalar_select %p179_p7, %s1365_s22, 124  ;;  %v1372_v0 = vld [vmem:[%s2073_s1] ss:$0 sm:$0xff]  ;;  %vm326_vm0 = vcmask 80896   ;;  %vm581_vm1 = vcmask 7168  }
  0x13   : > { %s653_s7 = ssub.s32 (%p1360_p4), 125, %s1365_s22  ;;  %s1129_s8 = smul.u32 (%p1360_p4), 504, %s1348_s2 }
  0x14   : > { %s1115_s24 = sshll.u32 %s180_s23, 3  ;;  %p654_p8 = scmp.lt.s32.totalorder (%p1360_p4), %s653_s7, 63 }
  0x15   : > { %s1377_s29 = scalar_lea.vmem %s2072_s0, %s1115_s24  ;;  %s1880_s11 = scalar_lea.vmem (%p1360_p4), %s2075_s3, %s1129_s8  }
  0x16   : > { %v193_v1 = vld [vmem:[%s1377_s29] sm:$0xff]  ;;  %v195_v2 = vld [vmem:[%s1377_s29 + $0x10] sm:$0xff]  ;;  %v194_v3 = vld [vmem:[%s1377_s29 + $0x8] sm:$0xff] }
  0x17   : > { %v263_v4 = vmul.f32 %v1372_v0, %v193_v1  ;;  %v265_v5 = vmul.f32 %v1372_v0, %v195_v2  ;;  %v264_v6 = vmul.f32 %v1372_v0, %v194_v3  ;;  %v196_v7 = vld [vmem:[%s1377_s29 + $0x18] sm:$0xff]  ;;  %v197_v9 = vld [vmem:[%s1377_s29 + $0x20] sm:$0xff]  ;;  %v198_v10 = vld [vmem:[%s1377_s29 + $0x28] sm:$0xff] }
  0x18   : > { %v266_v8 = vmul.f32 %v1372_v0, %v196_v7  ;;  %v267_v15 = vmul.f32 %v1372_v0, %v197_v9  ;;  %v268_v16 = vmul.f32 %v1372_v0, %v198_v10  ;;  %v199_v17 = vld [vmem:[%s1377_s29 + $0x30] sm:$0xff]  ;;  %v200_v18 = vld [vmem:[%s1377_s29 + $0x38] sm:$0xff]  ;;  %v201_v19 = vld [vmem:[%s1377_s29 + $0x40] sm:$0xff] }
  0x19   : > { %v327_v11 = vsel %vm326_vm0, %v263_v4, 0.0  ;;  %v333_v12 = vsel %vm326_vm0, %v265_v5, 0.0  ;;  %v330_v13 = vsel %vm326_vm0, %v264_v6, 0.0  ;;  %v202_v20 = vld [vmem:[%s1377_s29 + $0x48] sm:$0xff]  ;;  %v203_v21 = vld [vmem:[%s1377_s29 + $0x50] sm:$0xff]  ;;  %v204_v22 = vld [vmem:[%s1377_s29 + $0x58] sm:$0xff]  ;;  %v269_v25 = vmul.f32 %v1372_v0, %v199_v17 }
  0x1a   : > { %328 = vadd.xlane.f32.xlu0 %v327_v11  ;;  %334 = vadd.xlane.f32.xlu1 %v333_v12  ;;  %v336_v14 = vsel %vm326_vm0, %v266_v8, 0.0  ;;  %v339_v23 = vsel %vm326_vm0, %v267_v15, 0.0  ;;  %v342_v24 = vsel %vm326_vm0, %v268_v16, 0.0  ;;  %v270_v26 = vmul.f32 %v1372_v0, %v200_v18  ;;  %v205_v27 = vld [vmem:[%s1377_s29 + $0x60] sm:$0xff]  ;;  %v206_v28 = vld [vmem:[%s1377_s29 + $0x68] sm:$0xff]  ;;  %v207_v29 = vld [vmem:[%s1377_s29 + $0x70] sm:$0xff] }
  0x1b   : > { %v271_v30 = vmul.f32 %v1372_v0, %v201_v19  ;;  %v272_v31 = vmul.f32 %v1372_v0, %v202_v20  ;;  %v273_v32 = vmul.f32 %v1372_v0, %v203_v21  ;;  %v274_v33 = vmul.f32 %v1372_v0, %v204_v22  ;;  %v208_v34 = vld [vmem:[%s1377_s29 + $0x78] sm:$0xff]  ;;  %v209_v40 = vld [vmem:[%s1377_s29 + $0x80] sm:$0xff]  ;;  %v210_v41 = vld [vmem:[%s1377_s29 + $0x88] sm:$0xff] }
  0x1c   : > { %v275_v35 = vmul.f32 %v1372_v0, %v205_v27  ;;  %v276_v36 = vmul.f32 %v1372_v0, %v206_v28  ;;  %v277_v37 = vmul.f32 %v1372_v0, %v207_v29  ;;  %v345_v38 = vsel %vm326_vm0, %v269_v25, 0.0  ;;  %v225_v44 = vld [vmem:[%s1377_s29 + $0x100] sm:$0xff]  ;;  %v226_v45 = vld [vmem:[%s1377_s29 + $0x108] sm:$0xff]  ;;  %v227_v46 = vld [vmem:[%s1377_s29 + $0x110] sm:$0xff] }
  0x1d   : > { %v348_v39 = vsel %vm326_vm0, %v270_v26, 0.0  ;;  %v351_v42 = vsel %vm326_vm0, %v271_v30, 0.0  ;;  %v278_v43 = vmul.f32 %v1372_v0, %v208_v34  ;;  %v354_v47 = vsel %vm326_vm0, %v272_v31, 0.0  ;;  %v228_v50 = vld [vmem:[%s1377_s29 + $0x118] sm:$0xff]  ;;  %v229_v51 = vld [vmem:[%s1377_s29 + $0x120] sm:$0xff]  ;;  %v230_v52 = vld [vmem:[%s1377_s29 + $0x128] sm:$0xff] }
  0x1e   : > { %331 = vadd.xlane.f32.xlu0 %v330_v13  ;;  %337 = vadd.xlane.f32.xlu1 %v336_v14  ;;  %v357_v48 = vsel %vm326_vm0, %v273_v32, 0.0  ;;  %v360_v49 = vsel %vm326_vm0, %v274_v33, 0.0  ;;  %v1432_v53 = vsel %vm326_vm0, %v275_v35, 0.0  ;;  %v1435_v54 = vsel %vm326_vm0, %v276_v36, 0.0  ;;  %v231_v57 = vld [vmem:[%s1377_s29 + $0x130] sm:$0xff]  ;;  %v232_v62 = vld [vmem:[%s1377_s29 + $0x138] sm:$0xff] }
  0x1f   : > { %v1438_v55 = vsel %vm326_vm0, %v277_v37, 0.0  ;;  %v1441_v56 = vmul.f32 %v1372_v0, %v209_v40  ;;  %v1445_v58 = vmul.f32 %v1372_v0, %v210_v41  ;;  %v295_v59 = vmul.f32 %v1372_v0, %v225_v44  ;;  %v233_v4 = vld [vmem:[%s1377_s29 + $0x140] sm:$0xff]  ;;  %v234_v5 = vld [vmem:[%s1377_s29 + $0x148] sm:$0xff]  ;;  %v235_v6 = vld [vmem:[%s1377_s29 + $0x150] sm:$0xff] }
  0x20   : > { %v296_v60 = vmul.f32 %v1372_v0, %v226_v45  ;;  %v297_v61 = vmul.f32 %v1372_v0, %v227_v46  ;;  %v1452_v63 = vsel %vm326_vm0, %v278_v43, 0.0  ;;  %v298_v1 = vmul.f32 %v1372_v0, %v228_v50  ;;  %v236_v11 = vld [vmem:[%s1377_s29 + $0x158] sm:$0xff]  ;;  %v237_v12 = vld [vmem:[%s1377_s29 + $0x160] sm:$0xff]  ;;  %v238_v13 = vld [vmem:[%s1377_s29 + $0x168] sm:$0xff] }
  0x21   : > { %v299_v2 = vmul.f32 %v1372_v0, %v229_v51  ;;  %v300_v3 = vmul.f32 %v1372_v0, %v230_v52  ;;  %v1461_v7 = vsel %vm326_vm0, %v295_v59, 0.0  ;;  %v301_v10 = vmul.f32 %v1372_v0, %v231_v57  ;;  %v239_v18 = vld [vmem:[%s1377_s29 + $0x170] sm:$0xff]  ;;  %v241_v28 = vld [vmem:[%s1377_s29 + $0x180] sm:$0xff]  ;;  %v242_v29 = vld [vmem:[%s1377_s29 + $0x188] sm:$0xff] }
  0x22   : > { %340 = vadd.xlane.f32.xlu0 %v339_v23  ;;  %343 = vadd.xlane.f32.xlu1 %v342_v24  ;;  %v1464_v8 = vsel %vm326_vm0, %v296_v60, 0.0  ;;  %v1467_v9 = vsel %vm326_vm0, %v297_v61, 0.0  ;;  %v1474_v14 = vsel %vm326_vm0, %v298_v1, 0.0  ;;  %v302_v17 = vmul.f32 %v1372_v0, %v232_v62  ;;  %v240_v23 = vld [vmem:[%s1377_s29 + $0x178] sm:$0xff]  ;;  %v243_v30 = vld [vmem:[%s1377_s29 + $0x190] sm:$0xff]  ;;  %v245_v36 = vld [vmem:[%s1377_s29 + $0x1a0] sm:$0xff] }
  0x23   : > { %v1477_v15 = vsel %vm326_vm0, %v299_v2, 0.0  ;;  %v1480_v16 = vsel %vm326_vm0, %v300_v3, 0.0  ;;  %v1485_v19 = vsel %vm326_vm0, %v301_v10, 0.0  ;;  %v303_v20 = vmul.f32 %v1372_v0, %v233_v4  ;;  %v244_v35 = vld [vmem:[%s1377_s29 + $0x198] sm:$0xff]  ;;  %v246_v37 = vld [vmem:[%s1377_s29 + $0x1a8] sm:$0xff]  ;;  %v249_v52 = vld [vmem:[%s1377_s29 + $0x1c0] sm:$0xff] }
  0x24   : > { %v304_v21 = vmul.f32 %v1372_v0, %v234_v5  ;;  %v305_v22 = vmul.f32 %v1372_v0, %v235_v6  ;;  %v1492_v24 = vsel %vm326_vm0, %v302_v17, 0.0  ;;  %v306_v25 = vmul.f32 %v1372_v0, %v236_v11  ;;  %v250_v57 = vld [vmem:[%s1377_s29 + $0x1c8] sm:$0xff]  ;;  %v251_v59 = vld [vmem:[%s1377_s29 + $0x1d0] sm:$0xff]  ;;  %v252_v2 = vld [vmem:[%s1377_s29 + $0x1d8] sm:$0xff] }
  0x25   : > { %v307_v26 = vmul.f32 %v1372_v0, %v237_v12  ;;  %v308_v27 = vmul.f32 %v1372_v0, %v238_v13  ;;  %v1501_v31 = vsel %vm326_vm0, %v303_v20, 0.0  ;;  %v309_v34 = vmul.f32 %v1372_v0, %v239_v18  ;;  %v253_v3 = vld [vmem:[%s1377_s29 + $0x1e0] sm:$0xff]  ;;  %v254_v4 = vld [vmem:[%s1377_s29 + $0x1e8] sm:$0xff]  ;;  %v255_v12 = vld [vmem:[%s1377_s29 + $0x1f0] sm:$0xff] }
  0x26   : > { %346 = vadd.xlane.f32.xlu0 %v345_v38  ;;  %349 = vadd.xlane.f32.xlu1 %v348_v39  ;;  %v1504_v32 = vsel %vm326_vm0, %v304_v21, 0.0  ;;  %v1507_v33 = vsel %vm326_vm0, %v305_v22, 0.0  ;;  %v1514_v38 = vsel %vm326_vm0, %v306_v25, 0.0  ;;  %v310_v41 = vmul.f32 %v1372_v0, %v240_v23  ;;  %v211_v13 = vld [vmem:[%s1377_s29 + $0x90] sm:$0xff]  ;;  %v212_v20 = vld [vmem:[%s1377_s29 + $0x98] sm:$0xff] }
  0x27   : > { %v1517_v39 = vsel %vm326_vm0, %v307_v26, 0.0  ;;  %v1520_v40 = vsel %vm326_vm0, %v308_v27, 0.0  ;;  %v1525_v43 = vsel %vm326_vm0, %v309_v34, 0.0  ;;  %v311_v44 = vmul.f32 %v1372_v0, %v241_v28 }
  0x28   : > { %v312_v45 = vmul.f32 %v1372_v0, %v242_v29  ;;  %v313_v46 = vmul.f32 %v1372_v0, %v243_v30  ;;  %v315_v50 = vmul.f32 %v1372_v0, %v245_v36  ;;  %v316_v51 = vmul.f32 %v1372_v0, %v246_v37 }
  0x29   : > { %v1541_v60 = vsel %vm326_vm0, %v311_v44, 0.0  ;;  %v321_v18 = vmul.f32 %v1372_v0, %v251_v59  ;;  %v322_v22 = vmul.f32 %v1372_v0, %v252_v2  ;;  %v323_v23 = vmul.f32 %v1372_v0, %v253_v3  ;;  %v214_v44 = vld [vmem:[%s1377_s29 + $0xa8] sm:$0xff]  ;;  %v217_v59 = vld [vmem:[%s1377_s29 + $0xc0] sm:$0xff] }
  0x2a   : > { %352 = vadd.xlane.f32.xlu0 %v351_v42  ;;  %355 = vadd.xlane.f32.xlu1 %v354_v47  ;;  %v247_v42 = vld [vmem:[%s1377_s29 + $0x1b0] sm:$0xff]  ;;  %v248_v47 = vld [vmem:[%s1377_s29 + $0x1b8] sm:$0xff]  ;;  %v1544_v61 = vsel %vm326_vm0, %v312_v45, 0.0  ;;  %v1547_v62 = vsel %vm326_vm0, %v313_v46, 0.0  ;;  %v1559_v6 = vsel %vm326_vm0, %v315_v50, 0.0  ;;  %v1562_v10 = vsel %vm326_vm0, %v316_v51, 0.0 }
  0x2b   : > { %v317_v1 = vmul.f32 %v1372_v0, %v247_v42  ;;  %v318_v11 = vmul.f32 %v1372_v0, %v248_v47  ;;  %v324_v25 = vmul.f32 %v1372_v0, %v254_v4  ;;  %v1587_v28 = vsel %vm326_vm0, %v321_v18, 0.0  ;;  %v213_v42 = vld [vmem:[%s1377_s29 + $0xa0] sm:$0xff] }
  0x2c   : > { %v325_v29 = vmul.f32 %v1372_v0, %v255_v12  ;;  %v281_v30 = vmul.f32 %v1372_v0, %v211_v13  ;;  %v1594_v34 = vsel %vm326_vm0, %v322_v22, 0.0  ;;  %v375_v37 = vsel %vm326_vm0, %v1441_v56, 0.0  ;;  %v219_v12 = vld [vmem:[%s1377_s29 + $0xd0] sm:$0xff]  ;;  %v220_v13 = vld [vmem:[%s1377_s29 + $0xd8] sm:$0xff]  ;;  %v221_v22 = vld [vmem:[%s1377_s29 + $0xe0] sm:$0xff] }
  0x2d   : > { %v1568_v17 = vsel %vm326_vm0, %v317_v1, 0.0  ;;  %v1575_v21 = vsel %vm326_vm0, %v318_v11, 0.0  ;;  %v1600_v36 = vsel %vm326_vm0, %v324_v25, 0.0  ;;  %v283_v56 = vmul.f32 %v1372_v0, %v213_v42  ;;  %v218_v1 = vld [vmem:[%s1377_s29 + $0xc8] sm:$0xff] }
  0x2e   : > { %358 = vadd.xlane.f32.xlu0 %v357_v48  ;;  %361 = vadd.xlane.f32.xlu1 %v360_v49  ;;  %v1532_v48 = vsel %vm326_vm0, %v310_v41, 0.0  ;;  %v314_v49 = vmul.f32 %v1372_v0, %v244_v35  ;;  %v1597_v35 = vsel %vm326_vm0, %v323_v23, 0.0  ;;  %v1608_v41 = vsel %vm326_vm0, %v325_v29, 0.0  ;;  %v222_v23 = vld [vmem:[%s1377_s29 + $0xe8] sm:$0xff] }
  0x2f   : > { %v381_v45 = vsel %vm326_vm0, %v281_v30, 0.0  ;;  %v284_v47 = vmul.f32 %v1372_v0, %v214_v44  ;;  %v387_v50 = vsel %vm326_vm0, %v283_v56, 0.0  ;;  %v287_v4 = vmul.f32 %v1372_v0, %v217_v59 }
  0x30   : > { %v1556_v5 = vsel %vm326_vm0, %v314_v49, 0.0  ;;  %v216_v49 = vld [vmem:[%s1377_s29 + $0xb8] sm:$0xff]  ;;  %v288_v11 = vmul.f32 %v1372_v0, %v218_v1  ;;  %v289_v18 = vmul.f32 %v1372_v0, %v219_v12  ;;  %v291_v30 = vmul.f32 %v1372_v0, %v221_v22 }
  0x31   : > { %v390_v51 = vsel %vm326_vm0, %v284_v47, 0.0 }
  0x32   : > { %364 = vadd.xlane.f32.xlu0 %v1432_v53  ;;  %367 = vadd.xlane.f32.xlu1 %v1435_v54  ;;  %v319_v53 = vmul.f32 %v1372_v0, %v249_v52  ;;  %v320_v54 = vmul.f32 %v1372_v0, %v250_v57  ;;  %v286_v57 = vmul.f32 %v1372_v0, %v216_v49  ;;  %v405_v25 = vsel %vm326_vm0, %v289_v18, 0.0 }
  0x33   : > { %v411_v42 = vsel %vm326_vm0, %v291_v30, 0.0 }
  0x34   : > { %v1581_v26 = vsel %vm326_vm0, %v319_v53, 0.0  ;;  %v1584_v27 = vsel %vm326_vm0, %v320_v54, 0.0  ;;  %v396_v3 = vsel %vm326_vm0, %v286_v57, 0.0  ;;  %v399_v53 = vsel %vm326_vm0, %v287_v4, 0.0 }
  0x35   : > { %v402_v54 = vsel %vm326_vm0, %v288_v11, 0.0 }
  0x36   : > { %370 = vadd.xlane.f32.xlu0 %v1438_v55  ;;  %373 = vadd.xlane.f32.xlu1 %v1452_v63  ;;  %v378_v55 = vsel %vm326_vm0, %v1445_v58, 0.0  ;;  %v282_v63 = vmul.f32 %v1372_v0, %v212_v20  ;;  %v215_v58 = vld [vmem:[%s1377_s29 + $0xb0] sm:$0xff]  ;;  %v290_v20 = vmul.f32 %v1372_v0, %v220_v13 }
  0x37   : > { %v285_v52 = vmul.f32 %v1372_v0, %v215_v58 }
  0x38   : > { %v384_v46 = vsel %vm326_vm0, %v282_v63, 0.0  ;;  %v408_v29 = vsel %vm326_vm0, %v290_v20, 0.0  ;;  %v224_v63 = vld [vmem:[%s1377_s29 + $0xf8] sm:$0xff] }
  0x39   : > { %v393_v2 = vsel %vm326_vm0, %v285_v52, 0.0 }
  0x3a   : > { %376 = vadd.xlane.f32.xlu0 %v375_v37  ;;  %379 = vadd.xlane.f32.xlu1 %v378_v55  ;;  %v292_v37 = vmul.f32 %v1372_v0, %v222_v23  ;;  %v223_v55 = vld [vmem:[%s1377_s29 + $0xf0] sm:$0xff] }
  0x3c   : > { %v414_v44 = vsel %vm326_vm0, %v292_v37, 0.0 }
  0x3e   : > { %382 = vadd.xlane.f32.xlu0 %v381_v45  ;;  %385 = vadd.xlane.f32.xlu1 %v384_v46  ;;  %v293_v45 = vmul.f32 %v1372_v0, %v223_v55  ;;  %v294_v46 = vmul.f32 %v1372_v0, %v224_v63  ;;  %v1680_v0 = vstv %s516_s30 }
  0x40   : > { %v417_v56 = vsel %vm326_vm0, %v293_v45, 0.0  ;;  %v420_v47 = vsel %vm326_vm0, %v294_v46, 0.0 }
  0x42   : > { %388 = vadd.xlane.f32.xlu0 %v387_v50  ;;  %391 = vadd.xlane.f32.xlu1 %v390_v51 }
  0x46   : > { %394 = vadd.xlane.f32.xlu0 %v393_v2  ;;  %397 = vadd.xlane.f32.xlu1 %v396_v3 }
  0x4a   : > { %400 = vadd.xlane.f32.xlu0 %v399_v53  ;;  %403 = vadd.xlane.f32.xlu1 %v402_v54 }
  0x4e   : > { %406 = vadd.xlane.f32.xlu0 %v405_v25  ;;  %409 = vadd.xlane.f32.xlu1 %v408_v29 }
  0x52   : > { %412 = vadd.xlane.f32.xlu0 %v411_v42  ;;  %415 = vadd.xlane.f32.xlu1 %v414_v44 }
  0x56   : > { %418 = vadd.xlane.f32.xlu0 %v417_v56  ;;  %421 = vadd.xlane.f32.xlu1 %v420_v47 }
  0x5a   : > { %424 = vadd.xlane.f32.xlu0 %v1461_v7  ;;  %427 = vadd.xlane.f32.xlu1 %v1464_v8 }
  0x5e   : > { %430 = vadd.xlane.f32.xlu0 %v1467_v9  ;;  %433 = vadd.xlane.f32.xlu1 %v1474_v14 }
  0x62   : > { %436 = vadd.xlane.f32.xlu0 %v1477_v15  ;;  %439 = vadd.xlane.f32.xlu1 %v1480_v16 }
  0x66   : > { %442 = vadd.xlane.f32.xlu0 %v1485_v19  ;;  %445 = vadd.xlane.f32.xlu1 %v1492_v24 }
  0x6a   : > { %448 = vadd.xlane.f32.xlu0 %v1501_v31  ;;  %451 = vadd.xlane.f32.xlu1 %v1504_v32 }
  0x6e   : > { %454 = vadd.xlane.f32.xlu0 %v1507_v33  ;;  %457 = vadd.xlane.f32.xlu1 %v1514_v38 }
  0x72   : > { %460 = vadd.xlane.f32.xlu0 %v1517_v39  ;;  %463 = vadd.xlane.f32.xlu1 %v1520_v40 }
  0x76   : > { %466 = vadd.xlane.f32.xlu0 %v1525_v43  ;;  %469 = vadd.xlane.f32.xlu1 %v1532_v48 }
  0x7a   : > { %472 = vadd.xlane.f32.xlu0 %v1541_v60  ;;  %475 = vadd.xlane.f32.xlu1 %v1544_v61 }
  0x7e   : > { %478 = vadd.xlane.f32.xlu0 %v1547_v62  ;;  %481 = vadd.xlane.f32.xlu1 %v1556_v5 }
  0x82   : > { %484 = vadd.xlane.f32.xlu0 %v1559_v6  ;;  %487 = vadd.xlane.f32.xlu1 %v1562_v10 }
  0x86   : > { %490 = vadd.xlane.f32.xlu0 %v1568_v17  ;;  %493 = vadd.xlane.f32.xlu1 %v1575_v21 }
  0x8a   : > { %496 = vadd.xlane.f32.xlu0 %v1581_v26  ;;  %499 = vadd.xlane.f32.xlu1 %v1584_v27 }
  0x8e   : > { %502 = vadd.xlane.f32.xlu0 %v1587_v28  ;;  %505 = vadd.xlane.f32.xlu1 %v1594_v34 }
  0x92   : > { %508 = vadd.xlane.f32.xlu0 %v1597_v35  ;;  %511 = vadd.xlane.f32.xlu1 %v1600_v36 }
  0x96   : > { %514 = vadd.xlane.f32.xlu0 %v1608_v41 }
  0xa3   : > { %v329_v7 = vpop.xlane.xlu0 %328  ;;  %v335_v8 = vpop.xlane.xlu1 %334 }
  0xa4   : > { %v518_v9 = vadd.f32 %v1680_v0, %v329_v7  ;;  %v520_v14 = vadd.f32 %v1680_v0, %v335_v8 }
  0xa6   : > { %582 = vst.msk [vmem:[%s1684_s6] sm:$0xff] %vm581_vm1, %v518_v9  ;;  %584 = vst.msk [vmem:[%s1684_s6 + $0x10] sm:$0xff] %vm581_vm1, %v520_v14 }
  0xa7   : > { %v332_v15 = vpop.xlane.xlu0 %331  ;;  %v338_v16 = vpop.xlane.xlu1 %337 }
  0xa8   : > { %v519_v19 = vadd.f32 %v1680_v0, %v332_v15  ;;  %v521_v24 = vadd.f32 %v1680_v0, %v338_v16 }
  0xaa   : > { %583 = vst.msk [vmem:[%s1684_s6 + $0x8] sm:$0xff] %vm581_vm1, %v519_v19  ;;  %585 = vst.msk [vmem:[%s1684_s6 + $0x18] sm:$0xff] %vm581_vm1, %v521_v24 }
  0xab   : > { %v341_v31 = vpop.xlane.xlu0 %340  ;;  %v344_v32 = vpop.xlane.xlu1 %343 }
  0xac   : > { %v522_v33 = vadd.f32 %v1680_v0, %v341_v31  ;;  %v523_v38 = vadd.f32 %v1680_v0, %v344_v32 }
  0xae   : > { %586 = vst.msk [vmem:[%s1684_s6 + $0x20] sm:$0xff] %vm581_vm1, %v522_v33  ;;  %587 = vst.msk [vmem:[%s1684_s6 + $0x28] sm:$0xff] %vm581_vm1, %v523_v38 }
  0xaf   : > { %v347_v39 = vpop.xlane.xlu0 %346  ;;  %v350_v40 = vpop.xlane.xlu1 %349 }
  0xb0   : > { %v524_v43 = vadd.f32 %v1680_v0, %v347_v39  ;;  %v525_v48 = vadd.f32 %v1680_v0, %v350_v40 }
  0xb2   : > { %588 = vst.msk [vmem:[%s1684_s6 + $0x30] sm:$0xff] %vm581_vm1, %v524_v43  ;;  %589 = vst.msk [vmem:[%s1684_s6 + $0x38] sm:$0xff] %vm581_vm1, %v525_v48 }
  0xb3   : > { %v353_v60 = vpop.xlane.xlu0 %352  ;;  %v356_v61 = vpop.xlane.xlu1 %355 }
  0xb4   : > { %v526_v62 = vadd.f32 %v1680_v0, %v353_v60  ;;  %v527_v5 = vadd.f32 %v1680_v0, %v356_v61 }
  0xb6   : > { %590 = vst.msk [vmem:[%s1684_s6 + $0x40] sm:$0xff] %vm581_vm1, %v526_v62  ;;  %591 = vst.msk [vmem:[%s1684_s6 + $0x48] sm:$0xff] %vm581_vm1, %v527_v5 }
  0xb7   : > { %v359_v6 = vpop.xlane.xlu0 %358  ;;  %v362_v10 = vpop.xlane.xlu1 %361 }
  0xb8   : > { %v528_v17 = vadd.f32 %v1680_v0, %v359_v6  ;;  %v529_v21 = vadd.f32 %v1680_v0, %v362_v10 }
  0xba   : > { %592 = vst.msk [vmem:[%s1684_s6 + $0x50] sm:$0xff] %vm581_vm1, %v528_v17  ;;  %593 = vst.msk [vmem:[%s1684_s6 + $0x58] sm:$0xff] %vm581_vm1, %v529_v21 }
  0xbb   : > { %v365_v26 = vpop.xlane.xlu0 %364  ;;  %v368_v27 = vpop.xlane.xlu1 %367 }
  0xbc   : > { %v530_v28 = vadd.f32 %v1680_v0, %v365_v26  ;;  %v531_v34 = vadd.f32 %v1680_v0, %v368_v27 }
  0xbe   : > { %594 = vst.msk [vmem:[%s1684_s6 + $0x60] sm:$0xff] %vm581_vm1, %v530_v28  ;;  %595 = vst.msk [vmem:[%s1684_s6 + $0x68] sm:$0xff] %vm581_vm1, %v531_v34 }
  0xbf   : > { %v371_v35 = vpop.xlane.xlu0 %370  ;;  %v374_v36 = vpop.xlane.xlu1 %373 }
  0xc0   : > { %v532_v41 = vadd.f32 %v1680_v0, %v371_v35  ;;  %v533_v58 = vadd.f32 %v1680_v0, %v374_v36 }
  0xc2   : > { %596 = vst.msk [vmem:[%s1684_s6 + $0x70] sm:$0xff] %vm581_vm1, %v532_v41  ;;  %597 = vst.msk [vmem:[%s1684_s6 + $0x78] sm:$0xff] %vm581_vm1, %v533_v58 }
  0xc3   : > { %v377_v49 = vpop.xlane.xlu0 %376  ;;  %v380_v50 = vpop.xlane.xlu1 %379 }
  0xc4   : > { %v534_v51 = vadd.f32 %v1680_v0, %v377_v49  ;;  %v535_v52 = vadd.f32 %v1680_v0, %v380_v50 }
  0xc6   : > { %598 = vst.msk [vmem:[%s1684_s6 + $0x80] sm:$0xff] %vm581_vm1, %v534_v51  ;;  %599 = vst.msk [vmem:[%s1684_s6 + $0x88] sm:$0xff] %vm581_vm1, %v535_v52 }
  0xc7   : > { %v383_v57 = vpop.xlane.xlu0 %382  ;;  %v386_v59 = vpop.xlane.xlu1 %385 }
  0xc8   : > { %v536_v1 = vadd.f32 %v1680_v0, %v383_v57  ;;  %v537_v2 = vadd.f32 %v1680_v0, %v386_v59 }
  0xca   : > { %600 = vst.msk [vmem:[%s1684_s6 + $0x90] sm:$0xff] %vm581_vm1, %v536_v1  ;;  %601 = vst.msk [vmem:[%s1684_s6 + $0x98] sm:$0xff] %vm581_vm1, %v537_v2 }
  0xcb   : > { %v389_v3 = vpop.xlane.xlu0 %388  ;;  %v392_v4 = vpop.xlane.xlu1 %391 }
  0xcc   : > { %v538_v11 = vadd.f32 %v1680_v0, %v389_v3  ;;  %v539_v12 = vadd.f32 %v1680_v0, %v392_v4 }
  0xce   : > { %602 = vst.msk [vmem:[%s1684_s6 + $0xa0] sm:$0xff] %vm581_vm1, %v538_v11  ;;  %603 = vst.msk [vmem:[%s1684_s6 + $0xa8] sm:$0xff] %vm581_vm1, %v539_v12 }
  0xcf   : > { %v395_v13 = vpop.xlane.xlu0 %394  ;;  %v398_v53 = vpop.xlane.xlu1 %397 }
  0xd0   : > { %v540_v54 = vadd.f32 %v1680_v0, %v395_v13  ;;  %v541_v18 = vadd.f32 %v1680_v0, %v398_v53 }
  0xd2   : > { %604 = vst.msk [vmem:[%s1684_s6 + $0xb0] sm:$0xff] %vm581_vm1, %v540_v54  ;;  %605 = vst.msk [vmem:[%s1684_s6 + $0xb8] sm:$0xff] %vm581_vm1, %v541_v18 }
  0xd3   : > { %v401_v20 = vpop.xlane.xlu0 %400  ;;  %v404_v22 = vpop.xlane.xlu1 %403 }
  0xd4   : > { %v542_v23 = vadd.f32 %v1680_v0, %v401_v20  ;;  %v543_v25 = vadd.f32 %v1680_v0, %v404_v22 }
  0xd6   : > { %606 = vst.msk [vmem:[%s1684_s6 + $0xc0] sm:$0xff] %vm581_vm1, %v542_v23  ;;  %607 = vst.msk [vmem:[%s1684_s6 + $0xc8] sm:$0xff] %vm581_vm1, %v543_v25 }
  0xd7   : > { %v407_v29 = vpop.xlane.xlu0 %406  ;;  %v410_v30 = vpop.xlane.xlu1 %409 }
  0xd8   : > { %v544_v37 = vadd.f32 %v1680_v0, %v407_v29  ;;  %v545_v55 = vadd.f32 %v1680_v0, %v410_v30 }
  0xda   : > { %608 = vst.msk [vmem:[%s1684_s6 + $0xd0] sm:$0xff] %vm581_vm1, %v544_v37  ;;  %609 = vst.msk [vmem:[%s1684_s6 + $0xd8] sm:$0xff] %vm581_vm1, %v545_v55 }
  0xdb   : > { %v413_v63 = vpop.xlane.xlu0 %412  ;;  %v416_v42 = vpop.xlane.xlu1 %415 }
  0xdc   : > { %v546_v44 = vadd.f32 %v1680_v0, %v413_v63  ;;  %v547_v45 = vadd.f32 %v1680_v0, %v416_v42 }
  0xde   : > { %610 = vst.msk [vmem:[%s1684_s6 + $0xe0] sm:$0xff] %vm581_vm1, %v546_v44  ;;  %611 = vst.msk [vmem:[%s1684_s6 + $0xe8] sm:$0xff] %vm581_vm1, %v547_v45 }
  0xdf   : > { %v419_v46 = vpop.xlane.xlu0 %418  ;;  %v422_v56 = vpop.xlane.xlu1 %421 }
  0xe0   : > { %v548_v47 = vadd.f32 %v1680_v0, %v419_v46  ;;  %v549_v7 = vadd.f32 %v1680_v0, %v422_v56 }
  0xe2   : > { %612 = vst.msk [vmem:[%s1684_s6 + $0xf0] sm:$0xff] %vm581_vm1, %v548_v47  ;;  %613 = vst.msk [vmem:[%s1684_s6 + $0xf8] sm:$0xff] %vm581_vm1, %v549_v7 }
  0xe3   : > { %v425_v8 = vpop.xlane.xlu0 %424  ;;  %v428_v9 = vpop.xlane.xlu1 %427 }
  0xe4   : > { %v550_v14 = vadd.f32 %v1680_v0, %v425_v8  ;;  %v551_v15 = vadd.f32 %v1680_v0, %v428_v9 }
  0xe6   : > { %614 = vst.msk [vmem:[%s1684_s6 + $0x100] sm:$0xff] %vm581_vm1, %v550_v14  ;;  %615 = vst.msk [vmem:[%s1684_s6 + $0x108] sm:$0xff] %vm581_vm1, %v551_v15 }
  0xe7   : > { %v431_v16 = vpop.xlane.xlu0 %430  ;;  %v434_v19 = vpop.xlane.xlu1 %433 }
  0xe8   : > { %v552_v24 = vadd.f32 %v1680_v0, %v431_v16  ;;  %v553_v31 = vadd.f32 %v1680_v0, %v434_v19 }
  0xea   : > { %616 = vst.msk [vmem:[%s1684_s6 + $0x110] sm:$0xff] %vm581_vm1, %v552_v24  ;;  %617 = vst.msk [vmem:[%s1684_s6 + $0x118] sm:$0xff] %vm581_vm1, %v553_v31 }
  0xeb   : > { %v437_v32 = vpop.xlane.xlu0 %436  ;;  %v440_v33 = vpop.xlane.xlu1 %439 }
  0xec   : > { %v554_v38 = vadd.f32 %v1680_v0, %v437_v32  ;;  %v555_v39 = vadd.f32 %v1680_v0, %v440_v33 }
  0xee   : > { %618 = vst.msk [vmem:[%s1684_s6 + $0x120] sm:$0xff] %vm581_vm1, %v554_v38  ;;  %619 = vst.msk [vmem:[%s1684_s6 + $0x128] sm:$0xff] %vm581_vm1, %v555_v39 }
  0xef   : > { %v443_v40 = vpop.xlane.xlu0 %442  ;;  %v446_v43 = vpop.xlane.xlu1 %445 }
  0xf0   : > { %v556_v48 = vadd.f32 %v1680_v0, %v443_v40  ;;  %v557_v60 = vadd.f32 %v1680_v0, %v446_v43 }
  0xf2   : > { %620 = vst.msk [vmem:[%s1684_s6 + $0x130] sm:$0xff] %vm581_vm1, %v556_v48  ;;  %621 = vst.msk [vmem:[%s1684_s6 + $0x138] sm:$0xff] %vm581_vm1, %v557_v60 }
  0xf3   : > { %v449_v61 = vpop.xlane.xlu0 %448  ;;  %v452_v62 = vpop.xlane.xlu1 %451 }
  0xf4   : > { %v558_v5 = vadd.f32 %v1680_v0, %v449_v61  ;;  %v559_v6 = vadd.f32 %v1680_v0, %v452_v62 }
  0xf6   : > { %622 = vst.msk [vmem:[%s1684_s6 + $0x140] sm:$0xff] %vm581_vm1, %v558_v5  ;;  %623 = vst.msk [vmem:[%s1684_s6 + $0x148] sm:$0xff] %vm581_vm1, %v559_v6 }
  0xf7   : > { %v455_v10 = vpop.xlane.xlu0 %454  ;;  %v458_v17 = vpop.xlane.xlu1 %457 }
  0xf8   : > { %v560_v21 = vadd.f32 %v1680_v0, %v455_v10  ;;  %v561_v26 = vadd.f32 %v1680_v0, %v458_v17 }
  0xfa   : > { %624 = vst.msk [vmem:[%s1684_s6 + $0x150] sm:$0xff] %vm581_vm1, %v560_v21  ;;  %625 = vst.msk [vmem:[%s1684_s6 + $0x158] sm:$0xff] %vm581_vm1, %v561_v26 }
  0xfb   : > { %v461_v27 = vpop.xlane.xlu0 %460  ;;  %v464_v28 = vpop.xlane.xlu1 %463 }
  0xfc   : > { %v562_v34 = vadd.f32 %v1680_v0, %v461_v27  ;;  %v563_v35 = vadd.f32 %v1680_v0, %v464_v28 }
  0xfe   : > { %626 = vst.msk [vmem:[%s1684_s6 + $0x160] sm:$0xff] %vm581_vm1, %v562_v34  ;;  %627 = vst.msk [vmem:[%s1684_s6 + $0x168] sm:$0xff] %vm581_vm1, %v563_v35 }
  0xff   : > { %v467_v36 = vpop.xlane.xlu0 %466  ;;  %v470_v41 = vpop.xlane.xlu1 %469 }
 0x100   : > { %v564_v58 = vadd.f32 %v1680_v0, %v467_v36  ;;  %v565_v49 = vadd.f32 %v1680_v0, %v470_v41 }
 0x102   : > { %628 = vst.msk [vmem:[%s1684_s6 + $0x170] sm:$0xff] %vm581_vm1, %v564_v58  ;;  %629 = vst.msk [vmem:[%s1684_s6 + $0x178] sm:$0xff] %vm581_vm1, %v565_v49 }
 0x103   : > { %v473_v50 = vpop.xlane.xlu0 %472  ;;  %v476_v51 = vpop.xlane.xlu1 %475 }
 0x104   : > { %v566_v52 = vadd.f32 %v1680_v0, %v473_v50  ;;  %v567_v57 = vadd.f32 %v1680_v0, %v476_v51 }
 0x106   : > { %630 = vst.msk [vmem:[%s1684_s6 + $0x180] sm:$0xff] %vm581_vm1, %v566_v52  ;;  %631 = vst.msk [vmem:[%s1684_s6 + $0x188] sm:$0xff] %vm581_vm1, %v567_v57 }
 0x107   : > { %v479_v59 = vpop.xlane.xlu0 %478  ;;  %v482_v1 = vpop.xlane.xlu1 %481 }
 0x108   : > { %v568_v2 = vadd.f32 %v1680_v0, %v479_v59  ;;  %v569_v3 = vadd.f32 %v1680_v0, %v482_v1 }
 0x10a   : > { %632 = vst.msk [vmem:[%s1684_s6 + $0x190] sm:$0xff] %vm581_vm1, %v568_v2  ;;  %633 = vst.msk [vmem:[%s1684_s6 + $0x198] sm:$0xff] %vm581_vm1, %v569_v3 }
 0x10b   : > { %v485_v4 = vpop.xlane.xlu0 %484  ;;  %v488_v11 = vpop.xlane.xlu1 %487 }
 0x10c   : > { %v570_v12 = vadd.f32 %v1680_v0, %v485_v4  ;;  %v571_v13 = vadd.f32 %v1680_v0, %v488_v11 }
 0x10e   : > { %634 = vst.msk [vmem:[%s1684_s6 + $0x1a0] sm:$0xff] %vm581_vm1, %v570_v12  ;;  %635 = vst.msk [vmem:[%s1684_s6 + $0x1a8] sm:$0xff] %vm581_vm1, %v571_v13 }
 0x10f   : > { %v491_v53 = vpop.xlane.xlu0 %490  ;;  %v494_v54 = vpop.xlane.xlu1 %493 }
 0x110   : > { %v572_v18 = vadd.f32 %v1680_v0, %v491_v53  ;;  %v573_v20 = vadd.f32 %v1680_v0, %v494_v54 }
 0x112   : > { %636 = vst.msk [vmem:[%s1684_s6 + $0x1b0] sm:$0xff] %vm581_vm1, %v572_v18  ;;  %637 = vst.msk [vmem:[%s1684_s6 + $0x1b8] sm:$0xff] %vm581_vm1, %v573_v20 }
 0x113   : > { %v497_v22 = vpop.xlane.xlu0 %496  ;;  %v500_v23 = vpop.xlane.xlu1 %499 }
 0x114   : > { %v574_v25 = vadd.f32 %v1680_v0, %v497_v22  ;;  %v575_v29 = vadd.f32 %v1680_v0, %v500_v23 }
 0x116   : > { %638 = vst.msk [vmem:[%s1684_s6 + $0x1c0] sm:$0xff] %vm581_vm1, %v574_v25  ;;  %639 = vst.msk [vmem:[%s1684_s6 + $0x1c8] sm:$0xff] %vm581_vm1, %v575_v29 }
 0x117   : > { %v503_v30 = vpop.xlane.xlu0 %502  ;;  %v506_v37 = vpop.xlane.xlu1 %505 }
 0x118   : > { %v576_v55 = vadd.f32 %v1680_v0, %v503_v30  ;;  %v577_v63 = vadd.f32 %v1680_v0, %v506_v37 }
 0x11a   : > { %640 = vst.msk [vmem:[%s1684_s6 + $0x1d0] sm:$0xff] %vm581_vm1, %v576_v55  ;;  %641 = vst.msk [vmem:[%s1684_s6 + $0x1d8] sm:$0xff] %vm581_vm1, %v577_v63 }
 0x11b   : > { %v509_v42 = vpop.xlane.xlu0 %508  ;;  %v512_v44 = vpop.xlane.xlu1 %511 }
 0x11c   : > { %v578_v45 = vadd.f32 %v1680_v0, %v509_v42  ;;  %v579_v46 = vadd.f32 %v1680_v0, %v512_v44 }
 0x11e   : > { %642 = vst.msk [vmem:[%s1684_s6 + $0x1e0] sm:$0xff] %vm581_vm1, %v578_v45  ;;  %643 = vst.msk [vmem:[%s1684_s6 + $0x1e8] sm:$0xff] %vm581_vm1, %v579_v46  ;;  %651 = sbr.rel (!%p1360_p4) target bundleno = 369 (0x171), region = 36 }
 0x11f   : > { %v515_v56 = vpop.xlane.xlu0 %514 }
 0x120   : > { %v580_v47 = vadd.f32 %v1680_v0, %v515_v56 }
 0x122   : > { %644 = vst.msk [vmem:[%s1684_s6 + $0x1f0] sm:$0xff] %vm581_vm1, %v580_v47 }
 0x123   : > { %s2086_s7 = smov (!%p654_p8, %s653_s7), 63 }
 0x124   : > { %s1117_s12 = sshll.u32 %s2086_s7, 7 }
 0x125   : > { %p1120_p9 = scmp.eq.s32.totalorder %s1117_s12, 0 }
 0x126   : > { %1220 = sdivrem.u32 (!%p1120_p9), %s2086_s7, 63 }
 0x127   : > { %662 = sbr.rel (%p1120_p9) target bundleno = 369 (0x171), region = 40 }
 0x12f   : > { %s1886_s13 = spop.drf %1220 }
 0x130   : > { %p1121_p10 = scmp.le.s32.totalorder %s1886_s13, 0 }
 0x131   : > { %s2077_s14 = smov (!%p1121_p10), %s1880_s11  ;;  %s2078_s16 = smov (!%p1121_p10), %s1684_s6 }
 0x132   : > { %1067 = sbr.rel (%p1121_p10) target bundleno = 344 (0x158), region = 116  ;;  %s1895_s2 = smov (!%p1121_p10), 0  }
 0x133   : > { %s1897_s18 = smov (!%p1121_p10), 0  }
 0x137 LB: >> { %v851_v0 = vld [vmem:[%s1286_s16] sm:$0xff]  ;;  %v853_v7 = vld [vmem:[%s1286_s16 + $0x8] sm:$0xff]  ;;  %v855_v8 = vld [vmem:[%s1286_s16 + $0x10] sm:$0xff]  ;;  %s977_s19 = sadd.s32 1, %s1290_s2  ;;  %s845_s18 = sadd.s32 1, %s1294_s18   ;;  %s1294_s18 = sphi %s1897_s18, %s845_s18   ;;  %s1290_s2 = sphi %s1895_s2, %s2081_s2   ;;  %s1286_s16 = sphi %s2078_s16, %s2080_s16   ;;  %s1282_s14 = sphi %s2077_s14, %s2079_s14  }
 0x138   : >> { %852 = vst [vmem:[%s1282_s14] sm:$0xff] %v851_v0  ;;  %854 = vst [vmem:[%s1282_s14 + $0x8] sm:$0xff] %v853_v7  ;;  %v857_v9 = vld [vmem:[%s1286_s16 + $0x18] sm:$0xff]  ;;  %v859_v14 = vld [vmem:[%s1286_s16 + $0x20] sm:$0xff]  ;;  %p978_p11 = scmp.ge.s32.totalorder %s977_s19, %s1886_s13  ;;  %p844_p12 = scmp.ge.s32.totalorder %s845_s18, %s1886_s13 }
 0x139   : >> { %856 = vst [vmem:[%s1282_s14 + $0x10] sm:$0xff] %v855_v8  ;;  %v861_v15 = vld [vmem:[%s1286_s16 + $0x28] sm:$0xff]  ;;  %858 = vst [vmem:[%s1282_s14 + $0x18] sm:$0xff] %v857_v9  ;;  %v863_v16 = vld [vmem:[%s1286_s16 + $0x30] sm:$0xff] }
 0x13a   : >> { %860 = vst [vmem:[%s1282_s14 + $0x20] sm:$0xff] %v859_v14  ;;  %862 = vst [vmem:[%s1282_s14 + $0x28] sm:$0xff] %v861_v15  ;;  %v865_v19 = vld [vmem:[%s1286_s16 + $0x38] sm:$0xff]  ;;  %v867_v24 = vld [vmem:[%s1286_s16 + $0x40] sm:$0xff]  ;;  %s2088_s19 = smov (%p978_p11, %s977_s19), 0 }
 0x13b   : >> { %864 = vst [vmem:[%s1282_s14 + $0x30] sm:$0xff] %v863_v16  ;;  %866 = vst [vmem:[%s1282_s14 + $0x38] sm:$0xff] %v865_v19  ;;  %v869_v31 = vld [vmem:[%s1286_s16 + $0x48] sm:$0xff]  ;;  %v871_v32 = vld [vmem:[%s1286_s16 + $0x50] sm:$0xff]  ;;  %s980_s21 = smul.u32 504, %s2088_s19  ;;  %s2081_s2 = smov %s2088_s19 }
 0x13c   : >> { %868 = vst [vmem:[%s1282_s14 + $0x40] sm:$0xff] %v867_v24  ;;  %v873_v33 = vld [vmem:[%s1286_s16 + $0x58] sm:$0xff]  ;;  %870 = vst [vmem:[%s1282_s14 + $0x48] sm:$0xff] %v869_v31  ;;  %v875_v38 = vld [vmem:[%s1286_s16 + $0x60] sm:$0xff] }
 0x13d   : >> { %872 = vst [vmem:[%s1282_s14 + $0x50] sm:$0xff] %v871_v32  ;;  %874 = vst [vmem:[%s1282_s14 + $0x58] sm:$0xff] %v873_v33  ;;  %v877_v39 = vld [vmem:[%s1286_s16 + $0x68] sm:$0xff]  ;;  %v879_v40 = vld [vmem:[%s1286_s16 + $0x70] sm:$0xff]  ;;  %s1959_s22 = scalar_lea.vmem %s1684_s6, %s980_s21 [#allocation3]   ;;  %s1962_s23 = scalar_lea.vmem %s1880_s11, %s980_s21  }
 0x13e   : >> { %876 = vst [vmem:[%s1282_s14 + $0x60] sm:$0xff] %v875_v38  ;;  %878 = vst [vmem:[%s1282_s14 + $0x68] sm:$0xff] %v877_v39  ;;  %v881_v43 = vld [vmem:[%s1286_s16 + $0x78] sm:$0xff]  ;;  %v883_v48 = vld [vmem:[%s1286_s16 + $0x80] sm:$0xff] }
 0x13f   : >> { %880 = vst [vmem:[%s1282_s14 + $0x70] sm:$0xff] %v879_v40  ;;  %v885_v60 = vld [vmem:[%s1286_s16 + $0x88] sm:$0xff]  ;;  %882 = vst [vmem:[%s1282_s14 + $0x78] sm:$0xff] %v881_v43  ;;  %v887_v61 = vld [vmem:[%s1286_s16 + $0x90] sm:$0xff] }
 0x140   : >> { %884 = vst [vmem:[%s1282_s14 + $0x80] sm:$0xff] %v883_v48  ;;  %886 = vst [vmem:[%s1282_s14 + $0x88] sm:$0xff] %v885_v60  ;;  %v889_v62 = vld [vmem:[%s1286_s16 + $0x98] sm:$0xff]  ;;  %v891_v5 = vld [vmem:[%s1286_s16 + $0xa0] sm:$0xff] }
 0x141   : >> { %888 = vst [vmem:[%s1282_s14 + $0x90] sm:$0xff] %v887_v61  ;;  %890 = vst [vmem:[%s1282_s14 + $0x98] sm:$0xff] %v889_v62  ;;  %v893_v6 = vld [vmem:[%s1286_s16 + $0xa8] sm:$0xff]  ;;  %v895_v10 = vld [vmem:[%s1286_s16 + $0xb0] sm:$0xff] }
 0x142   : >> { %892 = vst [vmem:[%s1282_s14 + $0xa0] sm:$0xff] %v891_v5  ;;  %v897_v17 = vld [vmem:[%s1286_s16 + $0xb8] sm:$0xff]  ;;  %894 = vst [vmem:[%s1282_s14 + $0xa8] sm:$0xff] %v893_v6  ;;  %v899_v21 = vld [vmem:[%s1286_s16 + $0xc0] sm:$0xff] }
 0x143   : >> { %896 = vst [vmem:[%s1282_s14 + $0xb0] sm:$0xff] %v895_v10  ;;  %898 = vst [vmem:[%s1282_s14 + $0xb8] sm:$0xff] %v897_v17  ;;  %v901_v26 = vld [vmem:[%s1286_s16 + $0xc8] sm:$0xff]  ;;  %v903_v27 = vld [vmem:[%s1286_s16 + $0xd0] sm:$0xff] }
 0x144   : >> { %900 = vst [vmem:[%s1282_s14 + $0xc0] sm:$0xff] %v899_v21  ;;  %902 = vst [vmem:[%s1282_s14 + $0xc8] sm:$0xff] %v901_v26  ;;  %v905_v28 = vld [vmem:[%s1286_s16 + $0xd8] sm:$0xff]  ;;  %v907_v34 = vld [vmem:[%s1286_s16 + $0xe0] sm:$0xff] }
 0x145   : >> { %904 = vst [vmem:[%s1282_s14 + $0xd0] sm:$0xff] %v903_v27  ;;  %v909_v35 = vld [vmem:[%s1286_s16 + $0xe8] sm:$0xff]  ;;  %906 = vst [vmem:[%s1282_s14 + $0xd8] sm:$0xff] %v905_v28  ;;  %v911_v36 = vld [vmem:[%s1286_s16 + $0xf0] sm:$0xff] }
 0x146   : >> { %908 = vst [vmem:[%s1282_s14 + $0xe0] sm:$0xff] %v907_v34  ;;  %910 = vst [vmem:[%s1282_s14 + $0xe8] sm:$0xff] %v909_v35  ;;  %v913_v41 = vld [vmem:[%s1286_s16 + $0xf8] sm:$0xff]  ;;  %v915_v58 = vld [vmem:[%s1286_s16 + $0x100] sm:$0xff] }
 0x147   : >> { %912 = vst [vmem:[%s1282_s14 + $0xf0] sm:$0xff] %v911_v36  ;;  %914 = vst [vmem:[%s1282_s14 + $0xf8] sm:$0xff] %v913_v41  ;;  %v917_v49 = vld [vmem:[%s1286_s16 + $0x108] sm:$0xff]  ;;  %v919_v50 = vld [vmem:[%s1286_s16 + $0x110] sm:$0xff] }
 0x148   : >> { %916 = vst [vmem:[%s1282_s14 + $0x100] sm:$0xff] %v915_v58  ;;  %v921_v51 = vld [vmem:[%s1286_s16 + $0x118] sm:$0xff]  ;;  %918 = vst [vmem:[%s1282_s14 + $0x108] sm:$0xff] %v917_v49  ;;  %v923_v52 = vld [vmem:[%s1286_s16 + $0x120] sm:$0xff] }
 0x149   : >> { %920 = vst [vmem:[%s1282_s14 + $0x110] sm:$0xff] %v919_v50  ;;  %922 = vst [vmem:[%s1282_s14 + $0x118] sm:$0xff] %v921_v51  ;;  %v925_v57 = vld [vmem:[%s1286_s16 + $0x128] sm:$0xff]  ;;  %v927_v59 = vld [vmem:[%s1286_s16 + $0x130] sm:$0xff] }
 0x14a   : >> { %924 = vst [vmem:[%s1282_s14 + $0x120] sm:$0xff] %v923_v52  ;;  %926 = vst [vmem:[%s1282_s14 + $0x128] sm:$0xff] %v925_v57  ;;  %v929_v1 = vld [vmem:[%s1286_s16 + $0x138] sm:$0xff]  ;;  %v931_v2 = vld [vmem:[%s1286_s16 + $0x140] sm:$0xff] }
 0x14b   : >> { %928 = vst [vmem:[%s1282_s14 + $0x130] sm:$0xff] %v927_v59  ;;  %v933_v3 = vld [vmem:[%s1286_s16 + $0x148] sm:$0xff]  ;;  %930 = vst [vmem:[%s1282_s14 + $0x138] sm:$0xff] %v929_v1  ;;  %v935_v4 = vld [vmem:[%s1286_s16 + $0x150] sm:$0xff] }
 0x14c   : >> { %932 = vst [vmem:[%s1282_s14 + $0x140] sm:$0xff] %v931_v2  ;;  %934 = vst [vmem:[%s1282_s14 + $0x148] sm:$0xff] %v933_v3  ;;  %v937_v11 = vld [vmem:[%s1286_s16 + $0x158] sm:$0xff]  ;;  %v939_v12 = vld [vmem:[%s1286_s16 + $0x160] sm:$0xff] }
 0x14d   : >> { %936 = vst [vmem:[%s1282_s14 + $0x150] sm:$0xff] %v935_v4  ;;  %938 = vst [vmem:[%s1282_s14 + $0x158] sm:$0xff] %v937_v11  ;;  %v941_v13 = vld [vmem:[%s1286_s16 + $0x168] sm:$0xff]  ;;  %v943_v53 = vld [vmem:[%s1286_s16 + $0x170] sm:$0xff] }
 0x14e   : >> { %940 = vst [vmem:[%s1282_s14 + $0x160] sm:$0xff] %v939_v12  ;;  %v945_v54 = vld [vmem:[%s1286_s16 + $0x178] sm:$0xff]  ;;  %942 = vst [vmem:[%s1282_s14 + $0x168] sm:$0xff] %v941_v13  ;;  %v947_v18 = vld [vmem:[%s1286_s16 + $0x180] sm:$0xff] }
 0x14f   : >> { %944 = vst [vmem:[%s1282_s14 + $0x170] sm:$0xff] %v943_v53  ;;  %946 = vst [vmem:[%s1282_s14 + $0x178] sm:$0xff] %v945_v54  ;;  %v949_v20 = vld [vmem:[%s1286_s16 + $0x188] sm:$0xff]  ;;  %v951_v22 = vld [vmem:[%s1286_s16 + $0x190] sm:$0xff] }
 0x150   : >> { %948 = vst [vmem:[%s1282_s14 + $0x180] sm:$0xff] %v947_v18  ;;  %950 = vst [vmem:[%s1282_s14 + $0x188] sm:$0xff] %v949_v20  ;;  %v953_v23 = vld [vmem:[%s1286_s16 + $0x198] sm:$0xff]  ;;  %v955_v25 = vld [vmem:[%s1286_s16 + $0x1a0] sm:$0xff] }
 0x151   : >> { %952 = vst [vmem:[%s1282_s14 + $0x190] sm:$0xff] %v951_v22  ;;  %v957_v29 = vld [vmem:[%s1286_s16 + $0x1a8] sm:$0xff]  ;;  %954 = vst [vmem:[%s1282_s14 + $0x198] sm:$0xff] %v953_v23  ;;  %v959_v30 = vld [vmem:[%s1286_s16 + $0x1b0] sm:$0xff] }
 0x152   : >> { %956 = vst [vmem:[%s1282_s14 + $0x1a0] sm:$0xff] %v955_v25  ;;  %958 = vst [vmem:[%s1282_s14 + $0x1a8] sm:$0xff] %v957_v29  ;;  %v961_v37 = vld [vmem:[%s1286_s16 + $0x1b8] sm:$0xff]  ;;  %v963_v55 = vld [vmem:[%s1286_s16 + $0x1c0] sm:$0xff] }
 0x153   : >> { %960 = vst [vmem:[%s1282_s14 + $0x1b0] sm:$0xff] %v959_v30  ;;  %962 = vst [vmem:[%s1282_s14 + $0x1b8] sm:$0xff] %v961_v37  ;;  %v965_v63 = vld [vmem:[%s1286_s16 + $0x1c8] sm:$0xff]  ;;  %v967_v42 = vld [vmem:[%s1286_s16 + $0x1d0] sm:$0xff]  ;;  %847 = sbr.rel (!%p844_p12) target bundleno = 311 (0x137), region = 122 }
 0x154   : >> { %964 = vst [vmem:[%s1282_s14 + $0x1c0] sm:$0xff] %v963_v55  ;;  %v969_v44 = vld [vmem:[%s1286_s16 + $0x1d8] sm:$0xff]  ;;  %966 = vst [vmem:[%s1282_s14 + $0x1c8] sm:$0xff] %v965_v63  ;;  %v971_v45 = vld [vmem:[%s1286_s16 + $0x1e0] sm:$0xff] }
 0x155   : >> { %968 = vst [vmem:[%s1282_s14 + $0x1d0] sm:$0xff] %v967_v42  ;;  %970 = vst [vmem:[%s1282_s14 + $0x1d8] sm:$0xff] %v969_v44  ;;  %v973_v46 = vld [vmem:[%s1286_s16 + $0x1e8] sm:$0xff]  ;;  %v975_v56 = vld [vmem:[%s1286_s16 + $0x1f0] sm:$0xff]  ;;  %s2080_s16 = smov %s1959_s22 }
 0x156   : >> { %972 = vst [vmem:[%s1282_s14 + $0x1e0] sm:$0xff] %v971_v45  ;;  %974 = vst [vmem:[%s1282_s14 + $0x1e8] sm:$0xff] %v973_v46 }
 0x157   : >> { %976 = vst [vmem:[%s1282_s14 + $0x1f0] sm:$0xff] %v975_v56  ;;  %s2079_s14 = smov %s1962_s23 }
 0x158 PF: > { %1222 = sdivrem.u32 %s2086_s7, 63 }
 0x159   : > { %s1122_s24 = smul.u32 504, %s1886_s13 }
 0x15b   : > { %s988_s25 = scalar_lea.vmem %s1684_s6, %s1122_s24 [#allocation3]   ;;  %s990_s26 = scalar_lea.vmem %s1880_s11, %s1122_s24  }
 0x161   : > { %s1223_s27 = spop.drf %1222 }
 0x162   : > { %p1124_p13 = scmp.le.s32.totalorder %s1223_s27, 0 }
 0x163   : > { %s1296_s28 = smov (!%p1124_p13), %s990_s26   ;;  %s1300_s29 = smov (!%p1124_p13), %s988_s25  }
 0x164   : > { %1081 = sbr.rel (%p1124_p13) target bundleno = 369 (0x171), region = 127  ;;  %s1304_s30 = smov (!%p1124_p13), 0  }
 0x165   : > { %s1308_s4 = smov (!%p1124_p13), 0  }
 0x169 LB: >> { %v1000_v47 = vld [vmem:[%s1302_s29] sm:$0xff]  ;;  %s1002_s5 = sadd.s32 1, %s1306_s30  ;;  %s994_s4 = sadd.s32 1, %s1310_s4   ;;  %s1310_s4 = sphi %s1308_s4, %s994_s4   ;;  %s1306_s30 = sphi %s1304_s30, %s1305_s30   ;;  %s1302_s29 = sphi %s1300_s29, %s1007_s29   ;;  %s1298_s28 = sphi %s1296_s28, %s1008_s28  }
 0x16a   : >> { %1001 = vst [vmem:[%s1298_s28] sm:$0xff] %v1000_v47  ;;  %p1003_p0 = scmp.ge.s32.totalorder %s1002_s5, %s1223_s27  ;;  %p993_p1 = scmp.ge.s32.totalorder %s994_s4, %s1223_s27 }
 0x16c   : >> { %s2090_s5 = smov (%p1003_p0, %s1002_s5), 0  ;;  %996 = sbr.rel (!%p993_p1) target bundleno = 361 (0x169), region = 133 }
 0x16d   : >> { %s1125_s6 = sshll.u32 %s2090_s5, 3  ;;  %s1305_s30 = smov %s2090_s5  }
 0x16e   : >> { %s1007_s29 = scalar_lea.vmem %s988_s25, %s1125_s6 [#allocation3]   ;;  %s1008_s28 = scalar_lea.vmem %s990_s26, %s1125_s6  }
 0x171 PF: > { %p11_p2 = scmp.ge.s32.totalorder %s1350_s17, 4   ;;  %s2082_s14 = smov %s1274_s15 }
 0x172   : > { %s2083_s15 = smov %s1358_s20  ;;  %s2084_s16 = smov %s1350_s17 }
 0x173   :  { %13 = sbr.rel (!%p11_p2) target bundleno = 4 (0x4), region = 144 }

</bundles_post_ra>
